<compile_context>
chip_gen: v7x
topology: tpu7x:2x2x1
jax: 0.10.0
libtpu: 0.0.40
codegen_flags: <defaults>
</compile_context>

<pallas_src>
import jax
import jax.numpy as jnp
from jax.experimental import pallas as pl
from jax.experimental.pallas import tpu as pltpu

LN_EPS = 1e-6  # timm ConvNeXt-style head norm eps


def _head_kernel(x_ref, gamma_ref, beta_ref, w_ref, b_ref, o_ref):
    # x_ref: (TN, C, HW)   gamma/beta: (1, C)
    # w_ref: (C, NC_PAD)   b_ref: (1, NC_PAD)   o_ref: (TN, NC_PAD)
    x = x_ref[...].astype(jnp.float32)

    # Global average pool over the flattened spatial (lane) axis -> (TN, C).
    pooled = jnp.mean(x, axis=-1)

    # LayerNorm over the channel axis (per sample), biased variance + eps,
    # matching torch.nn.LayerNorm.
    mu = jnp.mean(pooled, axis=-1, keepdims=True)
    diff = pooled - mu
    var = jnp.mean(diff * diff, axis=-1, keepdims=True)
    inv = jax.lax.rsqrt(var + LN_EPS)
    normed = diff * inv * gamma_ref[...].astype(jnp.float32) \
             + beta_ref[...].astype(jnp.float32)

    # Dropout is identity at inference.
    # fc: (TN, C) @ (C, NC_PAD) + bias, f32 accumulation on the MXU.
    out = jnp.dot(normed, w_ref[...].astype(jnp.float32),
                  preferred_element_type=jnp.float32)
    o_ref[...] = (out + b_ref[...].astype(jnp.float32)).astype(o_ref.dtype)


def _round_up(v, m):
    return ((v + m - 1) // m) * m


def _pick_batch_tile(n, c, hw, itemsize, x_tile_budget_bytes):
    """Largest batch tile whose two pipeline buffers fit the x budget."""
    per_row = max(1, c * hw * itemsize)
    tn = max(1, x_tile_budget_bytes // (2 * per_row))
    tn = min(tn, n, 512)
    if tn < n:
        # Output block is (tn, NC_PAD): keep second-to-last dim 8-aligned
        # unless it spans the full batch.
        tn = min(n, max(8, (tn // 8) * 8))
    return tn


def multiheads_forward(x_nchw, head_params, forward_index,
                       *, x_tile_budget_bytes=16 * 1024 * 1024):
    """Run the head at `forward_index` (matches MultiHeads.forward)."""
    gamma, beta, w, b = head_params[forward_index]
    N, C, H, W = x_nchw.shape
    HW = H * W
    num_classes = w.shape[1]

    # Free reshape: (N, C, H, W) -> (N, C, H*W); no wrapper transpose
    # (that would cost an extra full HBM pass).
    x3 = x_nchw.reshape(N, C, HW)

    # Lane-dense output: zero-pad num_classes up to a multiple of 128.
    nc_pad = _round_up(max(num_classes, 1), 128)
    if nc_pad != num_classes:
        w_p = jnp.zeros((C, nc_pad), w.dtype).at[:, :num_classes].set(w)
        b_p = jnp.zeros((1, nc_pad), b.dtype).at[:, :num_classes].set(
            b.reshape(1, num_classes))
    else:
        w_p = w
        b_p = b.reshape(1, num_classes)

    gamma2 = gamma.reshape(1, C)
    beta2 = beta.reshape(1, C)

    tn = _pick_batch_tile(N, C, HW, jnp.dtype(x3.dtype).itemsize,
                          x_tile_budget_bytes)
    grid = (pl.cdiv(N, tn),)

    out = pl.pallas_call(
        _head_kernel,
        out_shape=jax.ShapeDtypeStruct((N, nc_pad), jnp.float32),
        grid=grid,
        in_specs=[
            # Streamed, double-buffered batch tiles of x.
            pl.BlockSpec((tn, C, HW), lambda i: (i, 0, 0)),
            # Grid-invariant parameters: constant block index -> stay resident.
            pl.BlockSpec((1, C), lambda i: (0, 0)),        # gamma
            pl.BlockSpec((1, C), lambda i: (0, 0)),        # beta
            pl.BlockSpec((C, nc_pad), lambda i: (0, 0)),   # fc weight (padded)
            pl.BlockSpec((1, nc_pad), lambda i: (0, 0)),   # fc bias   (padded)
        ],
        out_specs=pl.BlockSpec((tn, nc_pad), lambda i: (i, 0)),
        compiler_params=pltpu.CompilerParams(
            dimension_semantics=("parallel",),   # shard batch across v7x's 2 TCs
            vmem_limit_bytes=64 * 1024 * 1024,
        ),
    )(x3, gamma2, beta2, w_p, b_p)

    # Slice the real class columns back out (cheap, plain JAX).
    return out[:, :num_classes]


def init_head_params(key, num_features, num_head_classes):
    """Deterministic init of every head's (LayerNorm gamma/beta, fc W, fc b)."""
    params = []
    for i, nc in enumerate(num_head_classes):
        k1, k2 = jax.random.split(jax.random.fold_in(key, i))
        gamma = jnp.ones((1, num_features), jnp.float32)
        beta = jnp.zeros((1, num_features), jnp.float32)
        # nn.Linear default init: U(-1/sqrt(fan_in), 1/sqrt(fan_in))
        bound = 1.0 / jnp.sqrt(jnp.float32(num_features))
        w = jax.random.uniform(k1, (num_features, nc), jnp.float32, -bound, bound)
        b = jax.random.uniform(k2, (1, nc), jnp.float32, -bound, bound)
        params.append((gamma, beta, w, b))
    return params


if __name__ == "__main__":
    key = jax.random.PRNGKey(0)
    kx, kp = jax.random.split(key)

    # Small shapes: batch=2, channels(num_features)=32, spatial=8x8
    N, C, H, W = 2, 32, 8, 8
    num_head_classes = [10, 5]
    forward_index = 0

    x = jax.random.normal(kx, (N, C, H, W), jnp.float32)
    head_params = init_head_params(kp, C, num_head_classes)

    out = multiheads_forward(x, head_params, forward_index)
    jax.block_until_ready(out)

    # Reference check in plain JAX (avg-pool -> layernorm -> linear).
    gamma, beta, w, b = head_params[forward_index]
    pooled = x.mean(axis=(2, 3))
    mu = pooled.mean(-1, keepdims=True)
    var = ((pooled - mu) ** 2).mean(-1, keepdims=True)
    ref = (pooled - mu) / jnp.sqrt(var + LN_EPS) * gamma + beta
    ref = ref @ w + b

    assert out.shape == (N, num_head_classes[forward_index])
    assert jnp.allclose(out, ref, atol=1e-4, rtol=1e-4)

    print("KERNEL_OK")
</pallas_src>

<mosaic_0001>
module attributes {stable_mosaic.version = 11 : i64} {
  func.func @_head_kernel(%arg0: i32, %arg1: memref<2x32x64xf32, #tpu.memory_space<vmem>>, %arg2: memref<1x32xf32, #tpu.memory_space<vmem>>, %arg3: memref<1x32xf32, #tpu.memory_space<vmem>>, %arg4: memref<32x128xf32, #tpu.memory_space<vmem>>, %arg5: memref<1x128xf32, #tpu.memory_space<vmem>>, %arg6: memref<2x128xf32, #tpu.memory_space<vmem>>) attributes {dimension_semantics = [#tpu.dimension_semantics<parallel>], iteration_bounds = array<i64: 1>, scalar_prefetch = 0 : i64, scratch_operands = 0 : i64, tpu.core_type = #tpu.core_type<tc>, window_params = [{transform_indices = @transform_0, window_bounds = array<i64: 2, 32, 64>}, {pipeline_mode = #tpu.pipeline_mode<synchronous>, transform_indices = @transform_1, window_bounds = array<i64: 1, 32>}, {pipeline_mode = #tpu.pipeline_mode<synchronous>, transform_indices = @transform_2, window_bounds = array<i64: 1, 32>}, {pipeline_mode = #tpu.pipeline_mode<synchronous>, transform_indices = @transform_3, window_bounds = array<i64: 32, 128>}, {pipeline_mode = #tpu.pipeline_mode<synchronous>, transform_indices = @transform_4, window_bounds = array<i64: 1, 128>}, {transform_indices = @transform_5, window_bounds = array<i64: 2, 128>}]} {
    %c0 = arith.constant 0 : index
    %c0_0 = arith.constant 0 : index
    %c0_1 = arith.constant 0 : index
    %0 = vector.load %arg1[%c0, %c0_0, %c0_1] : memref<2x32x64xf32, #tpu.memory_space<vmem>>, vector<2x32x64xf32>
    %cst = arith.constant dense<0.000000e+00> : vector<2x32xf32>
    %1 = vector.multi_reduction <add>, %0, %cst [2] : vector<2x32x64xf32> to vector<2x32xf32>
    %cst_2 = arith.constant 6.400000e+01 : f32
    %2 = vector.broadcast %cst_2 : f32 to vector<2x32xf32>
    %3 = arith.divf %1, %2 : vector<2x32xf32>
    %cst_3 = arith.constant dense<0.000000e+00> : vector<2xf32>
    %4 = vector.multi_reduction <add>, %3, %cst_3 [1] : vector<2x32xf32> to vector<2xf32>
    %5 = vector.shape_cast %4 : vector<2xf32> to vector<2x1xf32>
    %cst_4 = arith.constant 3.200000e+01 : f32
    %6 = vector.broadcast %cst_4 : f32 to vector<2x1xf32>
    %7 = arith.divf %5, %6 : vector<2x1xf32>
    %8 = vector.broadcast %7 : vector<2x1xf32> to vector<2x32xf32>
    %9 = arith.subf %3, %8 : vector<2x32xf32>
    %10 = arith.mulf %9, %9 : vector<2x32xf32>
    %cst_5 = arith.constant dense<0.000000e+00> : vector<2xf32>
    %11 = vector.multi_reduction <add>, %10, %cst_5 [1] : vector<2x32xf32> to vector<2xf32>
    %12 = vector.shape_cast %11 : vector<2xf32> to vector<2x1xf32>
    %cst_6 = arith.constant 3.200000e+01 : f32
    %13 = vector.broadcast %cst_6 : f32 to vector<2x1xf32>
    %14 = arith.divf %12, %13 : vector<2x1xf32>
    %cst_7 = arith.constant 9.99999997E-7 : f32
    %15 = vector.broadcast %cst_7 : f32 to vector<2x1xf32>
    %16 = arith.addf %14, %15 : vector<2x1xf32>
    %17 = math.rsqrt %16 : vector<2x1xf32>
    %18 = vector.broadcast %17 : vector<2x1xf32> to vector<2x32xf32>
    %19 = arith.mulf %9, %18 : vector<2x32xf32>
    %c0_8 = arith.constant 0 : index
    %c0_9 = arith.constant 0 : index
    %20 = vector.load %arg2[%c0_8, %c0_9] : memref<1x32xf32, #tpu.memory_space<vmem>>, vector<1x32xf32>
    %21 = vector.broadcast %20 : vector<1x32xf32> to vector<2x32xf32>
    %22 = arith.mulf %19, %21 : vector<2x32xf32>
    %c0_10 = arith.constant 0 : index
    %c0_11 = arith.constant 0 : index
    %23 = vector.load %arg3[%c0_10, %c0_11] : memref<1x32xf32, #tpu.memory_space<vmem>>, vector<1x32xf32>
    %24 = vector.broadcast %23 : vector<1x32xf32> to vector<2x32xf32>
    %25 = arith.addf %22, %24 : vector<2x32xf32>
    %c0_12 = arith.constant 0 : index
    %c0_13 = arith.constant 0 : index
    %26 = vector.load %arg4[%c0_12, %c0_13] : memref<32x128xf32, #tpu.memory_space<vmem>>, vector<32x128xf32>
    %cst_14 = arith.constant dense<0.000000e+00> : vector<2x128xf32>
    %27 = tpu.matmul %25, %26, %cst_14 {dimension_numbers = #tpu.dot_dimension_numbers<[1], [0], [0], [1], [0, 0, 1, 1], [], []>} : vector<2x32xf32>, vector<32x128xf32>, vector<2x128xf32> -> vector<2x128xf32>
    %c0_15 = arith.constant 0 : index
    %c0_16 = arith.constant 0 : index
    %28 = vector.load %arg5[%c0_15, %c0_16] : memref<1x128xf32, #tpu.memory_space<vmem>>, vector<1x128xf32>
    %29 = vector.broadcast %28 : vector<1x128xf32> to vector<2x128xf32>
    %30 = arith.addf %27, %29 : vector<2x128xf32>
    %c0_17 = arith.constant 0 : index
    %c0_18 = arith.constant 0 : index
    %31 = vector.load %arg6[%c0_17, %c0_18] : memref<2x128xf32, #tpu.memory_space<vmem>>, vector<2x128xf32>
    tpu.vector_store %arg6[%c0_17, %c0_18], %30 {strides = array<i32>} : memref<2x128xf32, #tpu.memory_space<vmem>>, vector<2x128xf32>,
    return
  }
  func.func @transform_0(%arg0: i32) -> (i32, i32, i32) {
    %c0_i32 = arith.constant 0 : i32
    %c0_i32_0 = arith.constant 0 : i32
    %c0_i32_1 = arith.constant 0 : i32
    return %arg0, %c0_i32, %c0_i32_0 : i32, i32, i32
  }
  func.func @transform_1(%arg0: i32) -> (i32, i32) {
    %c0_i32 = arith.constant 0 : i32
    %c0_i32_0 = arith.constant 0 : i32
    %c0_i32_1 = arith.constant 0 : i32
    return %c0_i32, %c0_i32_0 : i32, i32
  }
  func.func @transform_2(%arg0: i32) -> (i32, i32) {
    %c0_i32 = arith.constant 0 : i32
    %c0_i32_0 = arith.constant 0 : i32
    %c0_i32_1 = arith.constant 0 : i32
    return %c0_i32, %c0_i32_0 : i32, i32
  }
  func.func @transform_3(%arg0: i32) -> (i32, i32) {
    %c0_i32 = arith.constant 0 : i32
    %c0_i32_0 = arith.constant 0 : i32
    %c0_i32_1 = arith.constant 0 : i32
    return %c0_i32, %c0_i32_0 : i32, i32
  }
  func.func @transform_4(%arg0: i32) -> (i32, i32) {
    %c0_i32 = arith.constant 0 : i32
    %c0_i32_0 = arith.constant 0 : i32
    %c0_i32_1 = arith.constant 0 : i32
    return %c0_i32, %c0_i32_0 : i32, i32
  }
  func.func @transform_5(%arg0: i32) -> (i32, i32) {
    %c0_i32 = arith.constant 0 : i32
    %c0_i32_0 = arith.constant 0 : i32
    return %arg0, %c0_i32 : i32, i32
  }
}

</mosaic_0001>

<bundles_post_ra>
// kernel: tpu_custom_call.1
= control target key start
LH: loop header
LB: loop body
LE: loop exit
PB: predicated region body
PF: predicated region fallthrough
CT: control target
= control target key end

     0   :  { %10 = vsyncpa [#allocation3], 0  ;;  %s956_s0 = inlined_call_operand.hbm [shape: f32[2,32,64], index: 0, kind: input, shape index: {}]   ;;  %s957_s1 = inlined_call_operand.hbm [shape: f32[1,32], index: 1, kind: input, shape index: {}]   ;;  %s958_s2 = inlined_call_operand.hbm [shape: f32[1,32], index: 2, kind: input, shape index: {}]   ;;  %s959_s3 = inlined_call_operand.hbm [shape: f32[32,128], index: 3, kind: input, shape index: {}]   ;;  %s960_s4 = inlined_call_operand.hbm [shape: f32[1,128], index: 4, kind: input, shape index: {}]   ;;  %s961_s5 = inlined_call_operand.hbm [shape: f32[2,128], index: 5, kind: output, shape index: {}]  }
   0x1   :  { %11 = vsyncpa [#allocation6], 0 }
   0x2   :  { %12 = vsyncpa [#allocation9], 0 }
   0x3   :  { %13 = vsyncpa [#allocation4], 0  ;;  %s733_s18 = smov [#allocation5]   ;;  %s593_s22 = scalar_lea.hbm %s957_s1, 16 }
   0x4   :  { %s32_s19 = sshll.u32 %s733_s18, 4  ;;  %p594_p0 = scmp.ne.s32.totalorder %s957_s1, %s593_s22  ;;  %s33_s19 = int_to_ptr.vmem [resolvable:$true] %s32_s19 }
   0x5   :  { %p597_p1 = scmp.lt.u32.totalorder %s593_s22, %s957_s1 }
   0x7   :  { %p599_p2 = pnand %p597_p1, %p594_p0 }
   0x9   :  { %602 = shalt.err (!%p599_p2)
}
   0xa   :  { %s603_s27 = scalar_lea.vmem %s33_s19, 16  ;;  %s607_s28 = scalar_lea.vmem %s33_s19, 32 }
   0xb   :  { %p604_p3 = scmp.ne.s32.totalorder %s33_s19, %s603_s27  ;;  %p608_p4 = scmp.lt.s32.totalorder %s33_s19, %s33_s19 }
   0xc   :  { %p609_p5 = scmp.lt.s32.totalorder %s607_s28, %s603_s27 }
   0xe   :  { %p610_p6 = por %p609_p5, %p608_p4 }
  0x10   :  { %p611_p7 = pnand %p610_p6, %p604_p3 }
  0x12   :  { %614 = shalt.err (!%p611_p7)
}
  0x13   :  { %35 = dma.hbm_to_vmem [thread:$0]  %s957_s1, 16, %s33_s19, [#allocation6]  }
  0x14   :  { %s734_s6 = smov [#allocation8]   ;;  %s735_s8 = smov [#allocation2]  }
  0x15   :  { %s51_s7 = sshll.u32 %s734_s6, 4  ;;  %s19_s9 = sshll.u32 %s735_s8, 4  ;;  %s52_s7 = int_to_ptr.vmem [resolvable:$true] %s51_s7  ;;  %s20_s9 = int_to_ptr.vmem [resolvable:$true] %s19_s9 }
  0x16   :  { %s615_s12 = scalar_lea.hbm %s959_s3, 512 }
  0x17   :  { %p616_p8 = scmp.ne.s32.totalorder %s959_s3, %s615_s12  ;;  %p619_p9 = scmp.lt.u32.totalorder %s615_s12, %s959_s3 }
  0x19   :  { %p621_p10 = pnand %p619_p9, %p616_p8 }
  0x1b   :  { %624 = shalt.err (!%p621_p10)
}
  0x1c   :  { %s625_s1 = scalar_lea.vmem %s52_s7, 512  ;;  %p630_p12 = scmp.lt.s32.totalorder %s52_s7, %s52_s7 }
  0x1d   :  { %p626_p11 = scmp.ne.s32.totalorder %s52_s7, %s625_s1  ;;  %p631_p13 = scmp.lt.s32.totalorder %s625_s1, %s625_s1 }
  0x1f   :  { %p632_p0 = por %p631_p13, %p630_p12 }
  0x21   :  { %p633_p1 = pnand %p632_p0, %p626_p11 }
  0x23   :  { %636 = shalt.err (!%p633_p1)
}
  0x24   :  { %s736_s17 = smov 128   ;;  %s737_s18 = smov 8  }
  0x25   :  { %57 = dma.hbm_to_vmem [thread:$0]  %s959_s3, 512, %s52_s7, [#allocation9], %s736_s17, %s736_s17, %s737_s18  }
  0x26   :  { %s637_s23 = scalar_lea.hbm %s956_s0, 1024 }
  0x27   :  { %p638_p2 = scmp.ne.s32.totalorder %s956_s0, %s637_s23  ;;  %p641_p3 = scmp.lt.u32.totalorder %s637_s23, %s956_s0 }
  0x29   :  { %p643_p4 = pnand %p641_p3, %p638_p2 }
  0x2b   :  { %646 = shalt.err (!%p643_p4)
}
  0x2c   :  { %s647_s28 = scalar_lea.vmem %s20_s9, 1024  ;;  %p652_p6 = scmp.lt.s32.totalorder %s20_s9, %s20_s9 }
  0x2d   :  { %p648_p5 = scmp.ne.s32.totalorder %s20_s9, %s647_s28  ;;  %p653_p7 = scmp.lt.s32.totalorder %s647_s28, %s647_s28 }
  0x2f   :  { %p654_p8 = por %p653_p7, %p652_p6 }
  0x31   :  { %p655_p9 = pnand %p654_p8, %p648_p5 }
  0x33   :  { %658 = shalt.err (!%p655_p9)
}
  0x34   :  { %25 = dma.hbm_to_vmem [thread:$0]  %s956_s0, 1024, %s20_s9, [#allocation3], %s736_s17, %s736_s17, %s737_s18  }
  0x35   :  { %s738_s30 = smov [#allocation7]   ;;  %s739_s7 = smov [#allocation10]  }
  0x36   :  { %s42_s6 = sshll.u32 %s738_s30, 4  ;;  %s64_s8 = sshll.u32 %s739_s7, 4  ;;  %s43_s6 = int_to_ptr.vmem [resolvable:$true] %s42_s6  ;;  %s65_s8 = int_to_ptr.vmem [resolvable:$true] %s64_s8 }
  0x37   :  { %s659_s12 = scalar_lea.hbm %s958_s2, 16 }
  0x38   :  { %p660_p10 = scmp.ne.s32.totalorder %s958_s2, %s659_s12  ;;  %p663_p11 = scmp.lt.u32.totalorder %s659_s12, %s958_s2 }
  0x3a   :  { %p665_p12 = pnand %p663_p11, %p660_p10 }
  0x3c   :  { %668 = shalt.err (!%p665_p12)
}
  0x3d   :  { %s669_s0 = scalar_lea.vmem %s43_s6, 16  ;;  %s673_s9 = scalar_lea.vmem %s43_s6, 32 }
  0x3e   :  { %p670_p13 = scmp.ne.s32.totalorder %s43_s6, %s669_s0  ;;  %p674_p0 = scmp.lt.s32.totalorder %s43_s6, %s43_s6 }
  0x3f   :  { %p675_p1 = scmp.lt.s32.totalorder %s673_s9, %s669_s0 }
  0x41   :  { %p676_p2 = por %p675_p1, %p674_p0 }
  0x43   :  { %p677_p3 = pnand %p676_p2, %p670_p13 }
  0x45   :  { %680 = shalt.err (!%p677_p3)
}
  0x46   :  { %45 = dma.hbm_to_vmem [thread:$0]  %s958_s2, 16, %s43_s6, [#allocation6]  }
  0x47   :  { %s681_s20 = scalar_lea.hbm %s960_s4, 16 }
  0x48   :  { %p682_p4 = scmp.ne.s32.totalorder %s960_s4, %s681_s20  ;;  %p685_p5 = scmp.lt.u32.totalorder %s681_s20, %s960_s4 }
  0x4a   :  { %p687_p6 = pnand %p685_p5, %p682_p4 }
  0x4c   :  { %690 = shalt.err (!%p687_p6)
}
  0x4d   :  { %s691_s25 = scalar_lea.vmem %s65_s8, 16  ;;  %s695_s26 = scalar_lea.vmem %s65_s8, 32 }
  0x4e   :  { %p692_p7 = scmp.ne.s32.totalorder %s65_s8, %s691_s25  ;;  %p696_p8 = scmp.lt.s32.totalorder %s65_s8, %s65_s8 }
  0x4f   :  { %p697_p9 = scmp.lt.s32.totalorder %s695_s26, %s691_s25 }
  0x51   :  { %p698_p10 = por %p697_p9, %p696_p8 }
  0x53   :  { %p699_p11 = pnand %p698_p10, %p692_p7 }
  0x55   :  { %702 = shalt.err (!%p699_p11)
}
  0x56   :  { %67 = dma.hbm_to_vmem [thread:$0]  %s960_s4, 16, %s65_s8, [#allocation9]  }
  0x57   :  { %725 = dma.done.wait [#allocation3], 1024  }
  0x58   :  { %726 = vsyncadd [#allocation3], 4294966272 }
  0x59   :  { %727 = dma.done.wait [#allocation6], 32  }
  0x5a   :  { %728 = vsyncadd [#allocation6], 4294967264 }
  0x5b   :  { %729 = dma.done.wait [#allocation9], 528  }
  0x5c   :  { %730 = vsyncadd [#allocation9], 4294966768  ;;  %vm91_vm0 = vcmask 523264   ;;  %v87_v0 = vld [vmem:[#allocation2 + $0x20] sm:$0xff]  ;;  %v88_v2 = vld [vmem:[#allocation2 + $0x28] sm:$0xff]  ;;  %v133_v16 = vlaneseq  ;;  %vm144_vm1 = vcmask 130112  }
  0x5d   :  { %v83_v1 = vld [vmem:[#allocation2] sm:$0xff]  ;;  %v104_v3 = vsel %vm91_vm0, %v87_v0, 0.0  ;;  %v84_v5 = vld [vmem:[#allocation2 + $0x8] sm:$0xff]  ;;  %v107_v6 = vsel %vm91_vm0, %v88_v2, 0.0  ;;  %v89_v8 = vld [vmem:[#allocation2 + $0x30] sm:$0xff]  ;;  %vm151_vm2 = vcmask 195712  }
  0x5e   :  { %v92_v4 = vsel %vm91_vm0, %v83_v1, 0.0  ;;  %105 = vadd.xlane.f32.xlu1 %v104_v3  ;;  %v95_v7 = vsel %vm91_vm0, %v84_v5, 0.0  ;;  %v85_v9 = vld [vmem:[#allocation2 + $0x10] sm:$0xff]  ;;  %v110_v10 = vsel %vm91_vm0, %v89_v8, 0.0  ;;  %v90_v12 = vld [vmem:[#allocation2 + $0x38] sm:$0xff]  ;;  %v134_v19 = vand.u32 127, %v133_v16 }
  0x5f   :  { %93 = vadd.xlane.f32.xlu0 %v92_v4  ;;  %v98_v11 = vsel %vm91_vm0, %v85_v9, 0.0  ;;  %v86_v13 = vld [vmem:[#allocation2 + $0x18] sm:$0xff]  ;;  %v113_v14 = vsel %vm91_vm0, %v90_v12, 0.0  ;;  %v843_v21 = vshrl.u32 %v133_v16, 7  ;;  %vm158_vm3 = vcmask 261312   ;;  %s744_s4 = smov [#allocation11]  }
  0x60   :  { %v101_v15 = vsel %vm91_vm0, %v86_v13, 0.0  ;;  %v139_v20 = vadd.s32 4294967288, %v134_v19  ;;  %v146_v24 = vadd.s32 4294967280, %v134_v19  ;;  %v153_v28 = vadd.s32 4294967272, %v134_v19  ;;  %s540_s28 = sshll.u32 %s744_s4, 4  ;;  %s541_s28 = int_to_ptr.vmem [resolvable:$true] %s540_s28 }
  0x61   :  { %v849_v29 = vsub.s32 %v134_v19, %v843_v21  ;;  %vm179_vm4 = vcmask 1041409   ;;  %vm182_vm5 = vcmask 254976   ;;  %v740_v58 = vmov 0   ;;  %s703_s3 = scalar_lea.vmem %s541_s28, 32  ;;  %p708_p13 = scmp.lt.s32.totalorder %s541_s28, %s541_s28 }
  0x62   :  { %108 = vadd.xlane.f32.xlu1 %v107_v6  ;;  %v846_v25 = vsub.s32 %v139_v20, %v843_v21  ;;  %v852_v30 = vsub.s32 %v146_v24, %v843_v21  ;;  %v857_v39 = vsub.s32 %v153_v28, %v843_v21  ;;  %590 = vset.pattern.permute.xlu0 %v740_v58  ;;  %v191_v59 = vsub.s32 0, %v843_v21  ;;  %p704_p12 = scmp.ne.s32.totalorder %s541_s28, %s703_s3  ;;  %p709_p0 = scmp.lt.s32.totalorder %s703_s3, %s703_s3 }
  0x63   :  { %96 = vadd.xlane.f32.xlu0 %v95_v7  ;;  %589 = vset.pattern.permute.xlu1 %v740_v58  ;;  %v195_v60 = vsub.s32 1, %v843_v21  ;;  %vm742_vm6 = vmmov 0   ;;  %vm460_vm7 = vcmask 261120  }
  0x64   :  { %p710_p1 = por %p709_p0, %p708_p13 }
  0x66   :  { %111 = vadd.xlane.f32.xlu1 %v110_v10  ;;  %p711_p2 = pnand %p710_p1, %p704_p12 }
  0x67   :  { %99 = vadd.xlane.f32.xlu0 %v98_v11 }
  0x6a   :  { %114 = vadd.xlane.f32.xlu1 %v113_v14 }
  0x6b   :  { %102 = vadd.xlane.f32.xlu0 %v101_v15 }
  0xeb   :  { %v106_v17 = vpop.xlane.xlu1 %105 }
  0xec   :  { %v94_v18 = vpop.xlane.xlu0 %93  ;;  %v121_v33 = vmul.f32 0.015625, %v106_v17  ;;  %v551_v17 = vld [vmem:[#allocation5] ss:$0 sm:$0xff] }
  0xed   :  { %v117_v34 = vmul.f32 0.015625, %v94_v18  ;;  %v552_v18 = vld [vmem:[#allocation7] ss:$0 sm:$0xff] }
  0xee   :  { %v163_v44 = vrot.slane %v121_v33, %v849_v29 }
  0xef   :  { %v109_v22 = vpop.xlane.xlu1 %108  ;;  %v138_v45 = vrot.slane %v117_v34, %v849_v29 }
  0xf0   :  { %v97_v23 = vpop.xlane.xlu0 %96  ;;  %v122_v26 = vmul.f32 0.015625, %v109_v22 }
  0xf1   :  { %v118_v27 = vmul.f32 0.015625, %v97_v23 }
  0xf2   :  { %v167_v37 = vrot.slane %v122_v26, %v846_v25 }
  0xf3   :  { %v112_v31 = vpop.xlane.xlu1 %111  ;;  %v143_v38 = vrot.slane %v118_v27, %v846_v25 }
  0xf4   :  { %v100_v32 = vpop.xlane.xlu0 %99  ;;  %v123_v35 = vmul.f32 0.015625, %v112_v31  ;;  %v168_v48 = vsel %vm144_vm1, %v167_v37, %v163_v44 }
  0xf5   :  { %v119_v36 = vmul.f32 0.015625, %v100_v32  ;;  %v145_v49 = vsel %vm144_vm1, %v143_v38, %v138_v45 }
  0xf6   :  { %v172_v40 = vrot.slane %v123_v35, %v852_v30 }
  0xf7   :  { %v150_v41 = vrot.slane %v119_v36, %v852_v30  ;;  %v115_v42 = vpop.xlane.xlu1 %114 }
  0xf8   :  { %v103_v43 = vpop.xlane.xlu0 %102  ;;  %v124_v46 = vmul.f32 0.015625, %v115_v42  ;;  %v173_v53 = vsel %vm151_vm2, %v172_v40, %v168_v48 }
  0xf9   :  { %v120_v47 = vmul.f32 0.015625, %v103_v43  ;;  %v152_v52 = vsel %vm151_vm2, %v150_v41, %v145_v49 }
  0xfa   :  { %v177_v50 = vrot.slane %v124_v46, %v857_v39 }
  0xfb   :  { %v157_v51 = vrot.slane %v120_v47, %v857_v39 }
  0xfc   :  { %v178_v55 = vsel %vm158_vm3, %v177_v50, %v173_v53 }
  0xfd   :  { %v159_v54 = vsel %vm158_vm3, %v157_v51, %v152_v52 }
  0xfe   :  { %v180_v56 = vsel %vm179_vm4, %v178_v55, %v159_v54 }
  0xff   :  { %v183_v57 = vsel %vm182_vm5, %v180_v56, 0.0 }
 0x100   :  { %184 = vadd.xlane.f32.xlu0 %v183_v57 }
 0x18d   :  { %v185_v61 = vpop.xlane.xlu0 %184 }
 0x18e   :  { %v187_v62 = vmul.f32 0.03125, %v185_v61 }
 0x190   :  { %v192_v63 = vrot.slane %v187_v62, %v191_v59  ;;  %v196_v0 = vrot.slane %v187_v62, %v195_v60 }
 0x192   :  { %v879_v1 = vsub.f32 %v118_v27, %v192_v63  ;;  %v881_v2 = vsub.f32 %v117_v34, %v192_v63  ;;  %v887_v5 = vsub.f32 %v121_v33, %v196_v0  ;;  %v891_v7 = vsub.f32 %v122_v26, %v196_v0 }
 0x193   :  { %v895_v9 = vsub.f32 %v119_v36, %v192_v63  ;;  %v205_v11 = vsub.f32 %v123_v35, %v196_v0  ;;  %v899_v13 = vsub.f32 %v120_v47, %v192_v63  ;;  %v206_v15 = vsub.f32 %v124_v46, %v196_v0 }
 0x194   :  { %v208_v3 = vmul.f32 %v879_v1, %v879_v1  ;;  %v207_v4 = vmul.f32 %v881_v2, %v881_v2  ;;  %v211_v6 = vmul.f32 %v887_v5, %v887_v5  ;;  %v212_v8 = vmul.f32 %v891_v7, %v891_v7 }
 0x195   :  { %v209_v10 = vmul.f32 %v895_v9, %v895_v9  ;;  %v213_v12 = vmul.f32 %v205_v11, %v205_v11  ;;  %v210_v14 = vmul.f32 %v899_v13, %v899_v13  ;;  %v214_v16 = vmul.f32 %v206_v15, %v206_v15 }
 0x196   :  { %227 = vperm.xlu0 %590, %v208_v3   ;;  %224 = vperm.xlu1 %589, %v207_v4  }
 0x19a   :  { %236 = vperm.xlu1 %589, %v211_v6   ;;  %319 = vbcast.lane.b32.xlu0 %v551_v17, 256 }
 0x19e   :  { %239 = vperm.xlu1 %589, %v212_v8   ;;  %323 = vbcast.lane.b32.xlu0 %v551_v17, 264 }
 0x1a2   :  { %230 = vperm.xlu1 %589, %v209_v10   ;;  %327 = vbcast.lane.b32.xlu0 %v551_v17, 272 }
 0x1a6   :  { %242 = vperm.xlu1 %589, %v213_v12   ;;  %331 = vbcast.lane.b32.xlu0 %v551_v17, 280 }
 0x1aa   :  { %233 = vperm.xlu1 %589, %v210_v14   ;;  %352 = vbcast.lane.b32.xlu0 %v552_v18, 256 }
 0x1ae   :  { %245 = vperm.xlu1 %589, %v214_v16   ;;  %356 = vbcast.lane.b32.xlu0 %v552_v18, 264 }
 0x1b2   :  { %360 = vbcast.lane.b32.xlu0 %v552_v18, 272 }
 0x1b6   :  { %364 = vbcast.lane.b32.xlu0 %v552_v18, 280 }
 0x215   :  { %v225_v19 = vpop.permute.xlu1 %224  ;;  %v228_v26 = vpop.permute.xlu0 %227 }
 0x216   :  { %v254_v28 = vrot.slane %v228_v26, %v846_v25  ;;  %v250_v31 = vrot.slane %v225_v19, %v849_v29 }
 0x218   :  { %v255_v38 = vsel %vm144_vm1, %v254_v28, %v250_v31  ;;  %v380_v28 = vld [vmem:[#allocation8 + $0x10] sm:$0xff]  ;;  %v381_v31 = vld [vmem:[#allocation8 + $0x18] sm:$0xff] }
 0x219   :  { %v237_v20 = vpop.permute.xlu1 %236  ;;  %v320_v48 = vpop.permute.xlu0 %319 }
 0x21a   :  { %v269_v35 = vrot.slane %v237_v20, %v849_v29 }
 0x21d   :  { %v240_v22 = vpop.permute.xlu1 %239  ;;  %v324_v49 = vpop.permute.xlu0 %323 }
 0x21e   :  { %v273_v32 = vrot.slane %v240_v22, %v846_v25 }
 0x220   :  { %v274_v40 = vsel %vm144_vm1, %v273_v32, %v269_v35  ;;  %v575_v32 = vpack.c.bf16 %v381_v31, %v380_v28 }
 0x221   :  { %v231_v23 = vpop.permute.xlu1 %230  ;;  %v328_v50 = vpop.permute.xlu0 %327 }
 0x222   :  { %v259_v33 = vrot.slane %v231_v23, %v852_v30  ;;  %v378_v23 = vld [vmem:[#allocation8] sm:$0xff] }
 0x224   :  { %v260_v42 = vsel %vm151_vm2, %v259_v33, %v255_v38 }
 0x225   :  { %v243_v24 = vpop.permute.xlu1 %242  ;;  %v332_v54 = vpop.permute.xlu0 %331 }
 0x226   :  { %v278_v34 = vrot.slane %v243_v24, %v852_v30  ;;  %v379_v24 = vld [vmem:[#allocation8 + $0x8] sm:$0xff] }
 0x227   :  { %v572_v26 = vpack.c.bf16 %v379_v24, %v378_v23 }
 0x228   :  { %v279_v43 = vsel %vm151_vm2, %v278_v34, %v274_v40 }
 0x229   :  { %v234_v27 = vpop.permute.xlu1 %233  ;;  %v353_v55 = vpop.permute.xlu0 %352 }
 0x22a   :  { %v264_v36 = vrot.slane %v234_v27, %v857_v39 }
 0x22c   :  { %v265_v44 = vsel %vm158_vm3, %v264_v36, %v260_v42 }
 0x22d   :  { %v246_v37 = vpop.permute.xlu1 %245  ;;  %v357_v61 = vpop.permute.xlu0 %356 }
 0x22e   :  { %v283_v41 = vrot.slane %v246_v37, %v857_v39 }
 0x230   :  { %v284_v45 = vsel %vm158_vm3, %v283_v41, %v279_v43 }
 0x231   :  { %v285_v46 = vsel %vm179_vm4, %v284_v45, %v265_v44  ;;  %v361_v12 = vpop.permute.xlu0 %360 }
 0x232   :  { %v287_v47 = vsel %vm182_vm5, %v285_v46, 0.0 }
 0x233   :  { %288 = vadd.xlane.f32.xlu1 %v287_v47 }
 0x235   :  { %v365_v18 = vpop.permute.xlu0 %364 }
 0x2c0   :  { %v289_v51 = vpop.xlane.xlu1 %288 }
 0x2c1   :  { %v290_v52 = vmul.f32 0.03125, %v289_v51 }
 0x2c3   :  { %v291_v53 = vadd.f32 1e-06, %v290_v52 }
 0x2c5   :  { %591 = vrsqrt.f32 %v291_v53 }
 0x2cf   :  { %v592_v56 = vpop.eup %591 }
 0x2d0   :  { %v297_v57 = vrot.slane %v592_v56, %v191_v59  ;;  %v301_v58 = vrot.slane %v592_v56, %v195_v60 }
 0x2d2   :  { %v310_v62 = vmul.f32 %v301_v58, %v205_v11  ;;  %v304_v63 = vmul.f32 %v297_v57, %v881_v2  ;;  %v308_v0 = vmul.f32 %v301_v58, %v887_v5  ;;  %v305_v3 = vmul.f32 %v297_v57, %v879_v1 }
 0x2d3   :  { %v311_v8 = vmul.f32 %v301_v58, %v206_v15  ;;  %v309_v10 = vmul.f32 %v301_v58, %v891_v7  ;;  %v306_v21 = vmul.f32 %v297_v57, %v895_v9  ;;  %v307_v15 = vmul.f32 %v297_v57, %v899_v13 }
 0x2d4   :  { %v337_v4 = vmul.f32 %v320_v48, %v304_v63  ;;  %v338_v6 = vmul.f32 %v324_v49, %v305_v3  ;;  %v343_v14 = vmul.f32 %v328_v50, %v310_v62  ;;  %v341_v16 = vmul.f32 %v320_v48, %v308_v0 }
 0x2d5   :  { %v344_v60 = vmul.f32 %v332_v54, %v311_v8  ;;  %v342_v11 = vmul.f32 %v324_v49, %v309_v10  ;;  %v339_v1 = vmul.f32 %v328_v50, %v306_v21  ;;  %v340_v20 = vmul.f32 %v332_v54, %v307_v15 }
 0x2d6   :  { %v370_v59 = vadd.f32 %v353_v55, %v337_v4  ;;  %v371_v17 = vadd.f32 %v357_v61, %v338_v6  ;;  %v374_v2 = vadd.f32 %v353_v55, %v341_v16  ;;  %v376_v5 = vadd.f32 %v361_v12, %v343_v14 }
 0x2d7   :  { %v375_v7 = vadd.f32 %v357_v61, %v342_v11  ;;  %v377_v19 = vadd.f32 %v365_v18, %v344_v60  ;;  %v372_v22 = vadd.f32 %v361_v12, %v339_v1  ;;  %v741_v9 = vmov 0.0|0.0  }
 0x2d8   :  { %401 = vperm.xlu0 %590, %v371_v17   ;;  %398 = vperm.xlu1 %589, %v370_v59   ;;  %v373_v27 = vadd.f32 %v365_v18, %v340_v20  ;;  %v743_v13 = vmov 0.0  }
 0x2d9   :  { %571 = vmatprep.subr.bf16.mxu0 %v741_v9  ;;  %568 = vmatprep.mubr.msk.f32.mxu0 %vm742_vm6, %v743_v13 }
 0x2da   :  { %573 = vmatpush3.bf16.msra.mxu0 %v572_v26 }
 0x2db   :  { %574 = vmatprep.subr.bf16.mxu0 %v741_v9 }
 0x2dc   :  { %410 = vperm.xlu0 %590, %v374_v2   ;;  %416 = vperm.xlu1 %589, %v376_v5  }
 0x2de   :  { %576 = vmatpush3.bf16.msra.mxu0 %v575_v32 }
 0x2e0   :  { %413 = vperm.xlu0 %590, %v375_v7   ;;  %419 = vperm.xlu1 %589, %v377_v19  }
 0x2e4   :  { %404 = vperm.xlu0 %590, %v372_v22  }
 0x2e8   :  { %407 = vperm.xlu0 %590, %v373_v27  }
 0x357   :  { %v402_v33 = vpop.permute.xlu0 %401  ;;  %v399_v34 = vpop.permute.xlu1 %398 }
 0x358   :  { %v428_v42 = vrot.slane %v402_v33, %v846_v25  ;;  %v424_v43 = vrot.slane %v399_v34, %v849_v29 }
 0x35a   :  { %v429_v50 = vsel %vm144_vm1, %v428_v42, %v424_v43 }
 0x35b   :  { %v411_v35 = vpop.permute.xlu0 %410  ;;  %v417_v36 = vpop.permute.xlu1 %416 }
 0x35c   :  { %v443_v40 = vrot.slane %v411_v35, %v849_v29  ;;  %v452_v45 = vrot.slane %v417_v36, %v852_v30 }
 0x35f   :  { %v414_v37 = vpop.permute.xlu0 %413  ;;  %v420_v46 = vpop.permute.xlu1 %419 }
 0x360   :  { %v447_v38 = vrot.slane %v414_v37, %v846_v25  ;;  %v457_v51 = vrot.slane %v420_v46, %v857_v39 }
 0x362   :  { %v448_v44 = vsel %vm144_vm1, %v447_v38, %v443_v40 }
 0x363   :  { %v405_v41 = vpop.permute.xlu0 %404  ;;  %v453_v48 = vsel %vm151_vm2, %v452_v45, %v448_v44 }
 0x364   :  { %v433_v47 = vrot.slane %v405_v41, %v852_v30  ;;  %v458_v29 = vsel %vm158_vm3, %v457_v51, %v453_v48  ;;  %v553_v30 = vld [vmem:[#allocation10] ss:$0 sm:$0xff] }
 0x366   :  { %v434_v25 = vsel %vm151_vm2, %v433_v47, %v429_v50 }
 0x367   :  { %v408_v49 = vpop.permute.xlu0 %407 }
 0x368   :  { %v438_v52 = vrot.slane %v408_v49, %v857_v39 }
 0x36a   :  { %v439_v53 = vsel %vm158_vm3, %v438_v52, %v434_v25 }
 0x36b   :  { %v459_v54 = vsel %vm179_vm4, %v458_v29, %v439_v53 }
 0x36c   :  { %569 = vmatmul.mubr.msk.f32.vlgmr.msra.gmra.mrb[0].mxu0 %vm460_vm7, %v459_v54 }
 0x43f   :  { %v529_v55 = vpop.f32.mrb[0].mxu0 }
 0x440   :  { %v530_v56 = vadd.f32 %v553_v30, %v529_v55  ;;  %v570_v57 = vpop.f32.mrb[1].mxu0 }
 0x442   :  { %533 = vst [vmem:[#allocation11] sm:$0x3] %v530_v56 }
 0x443   :  { %714 = shalt.err (!%p711_p2)
}
 0x444   :  { %s715_s6 = scalar_lea.hbm %s961_s5, 32 }
 0x445   :  { %p716_p3 = scmp.ne.s32.totalorder %s961_s5, %s715_s6  ;;  %p719_p4 = scmp.lt.u32.totalorder %s715_s6, %s961_s5 }
 0x447   :  { %p721_p5 = pnand %p719_p4, %p716_p3 }
 0x449   :  { %724 = shalt.err (!%p721_p5)
}
 0x44a   :  { %543 = dma.vmem_to_hbm [thread:$0]  %s541_s28, 32, %s961_s5, [#allocation4]  }
 0x44b   :  { %731 = dma.done.wait [#allocation4], 32  }
 0x44c   :  { %732 = vsyncadd [#allocation4], 4294967264 }
 0x44d   :  { %547 = vsyncpa [#allocation3], 1 }
 0x44e   :  { %548 = vsyncpa [#allocation6], 1 }
 0x44f   :  { %549 = vsyncpa [#allocation9], 1 }
 0x450   :  { %550 = vsyncpa [#allocation4], 1 }

</bundles_post_ra>
